<compile_context>
chip_gen: v5e
topology: v5e:2x2
jax: 0.10.0
libtpu: 0.0.40
codegen_flags: <defaults>
</compile_context>

<pallas_src>
import functools

import jax
import jax.numpy as jnp
from jax.experimental import pallas as pl
from jax.experimental.pallas import tpu as pltpu


_LANE = 128        # vreg lane width / MXU N granularity
_SUBLANE = 8       # vreg sublane count / M granularity

_HAS_BUFFERED = hasattr(pl, "Buffered")

_FALLBACK_ERRORS = (TypeError, NotImplementedError)
try:
    _FALLBACK_ERRORS = _FALLBACK_ERRORS + (pltpu.LoweringException,)
except AttributeError:
    pass


def _round_up(x, m):
    return ((x + m - 1) // m) * m


@functools.lru_cache(maxsize=1)
def _tpu_config():
    """Returns (vmem_capacity_bytes, num_tensorcores_per_device), defensively."""
    vmem_cap = 64 * 1024 * 1024          # conservative fallback (v7x per-TC VMEM)
    cap_known = False
    try:
        info = pltpu.get_tpu_info()
        cap = getattr(info, "vmem_capacity_bytes", None)
        if cap:
            vmem_cap = int(cap)
            cap_known = True
    except Exception:
        pass
    try:
        kind = str(getattr(jax.devices()[0], "device_kind", "")).lower()
    except Exception:
        kind = ""
    num_tc = 1
    # v7x has two TensorCores per device (and 64 MiB VMEM per TC).
    if "v7" in kind or (cap_known and vmem_cap <= 64 * 1024 * 1024):
        num_tc = 2
    return vmem_cap, num_tc


# ----------------------------- kernels -------------------------------------


def _kernel_fused(x_ref, w1_ref, b1_ref, w2_ref, b2_ref, o_ref):
    """Single K step: no scratch accumulator round trip."""
    h = jnp.dot(x_ref[...], w1_ref[...], preferred_element_type=jnp.float32)
    h = jnp.maximum(h + b1_ref[...], 0.0)                      # bias + ReLU in f32
    y = jnp.dot(h.astype(w2_ref.dtype), w2_ref[...],
                preferred_element_type=jnp.float32)
    o_ref[...] = (y + b2_ref[...]).astype(o_ref.dtype)


def _kernel_ksplit(x_ref, w1_ref, b1_ref, w2_ref, b2_ref, o_ref, acc_ref):
    """K (input_dim) reduction split over grid axis 1 with an f32 accumulator."""
    k = pl.program_id(1)

    @pl.when(k == 0)
    def _():
        acc_ref[...] = jnp.zeros_like(acc_ref)

    acc_ref[...] += jnp.dot(x_ref[...], w1_ref[...],
                            preferred_element_type=jnp.float32)

    @pl.when(k == pl.num_programs(1) - 1)
    def _():
        h = jnp.maximum(acc_ref[...] + b1_ref[...], 0.0)
        y = jnp.dot(h.astype(w2_ref.dtype), w2_ref[...],
                    preferred_element_type=jnp.float32)
        o_ref[...] = (y + b2_ref[...]).astype(o_ref.dtype)


# ----------------------------- wrapper --------------------------------------


@functools.partial(
    jax.jit,
    static_argnames=("block_m", "block_k", "compute_dtype", "single_buffer"))
def _projection_head_impl(x, w1, b1, w2, b2, *, block_m=None, block_k=None,
                          compute_dtype=jnp.bfloat16, single_buffer=True):
    B, input_dim = x.shape
    kin, proj_dim = w1.shape
    assert kin == input_dim
    out_dtype = x.dtype

    vmem_cap, num_tc = _tpu_config()
    budget = int(vmem_cap * 0.55)                                   # tile footprint
    vmem_limit = max(32 << 20, min(int(vmem_cap * 0.75), 128 << 20))

    csize = jnp.dtype(compute_dtype).itemsize
    osize = jnp.dtype(out_dtype).itemsize
    proj_pad = _round_up(proj_dim, _LANE)          # lane-dense output / MXU N axis
    sb = bool(single_buffer) and _HAS_BUFFERED

    # ---- K (input_dim) tiling: prefer a single K step whenever w1 fits ----
    if block_k is None:
        w1_full = input_dim * proj_pad * csize * (1 if sb else 2)
        fixed = (proj_pad * proj_pad * csize * (1 if sb else 2)     # w2 resident
                 + 2 * proj_pad * 4                                 # biases (f32)
                 + 2 * _SUBLANE * (input_dim * csize + proj_pad * (osize + 4)))
        if w1_full + fixed <= budget:
            block_k = input_dim
        else:
            bk = (budget // 3) // (2 * proj_pad * csize)            # dbl-buffered w1 tile
            block_k = min(_round_up(input_dim, _LANE),
                          max(_LANE, (bk // _LANE) * _LANE))
    if block_k >= input_dim:
        block_k, k_pad, k_steps = input_dim, input_dim, 1
    else:
        block_k = max(_LANE, (block_k // _LANE) * _LANE)            # lane-aligned x tile
        k_pad = _round_up(input_dim, block_k)
        k_steps = k_pad // block_k

    # ---- M (batch) tiling: budget-bounded; split only when 2 TCs exist ----
    def _tile_bytes(bm):
        msteps = _round_up(B, bm) // bm
        x_nb = 1 if (sb and msteps == 1 and k_steps == 1) else 2
        o_nb = 1 if (sb and msteps == 1) else 2
        w1_nb = 2 if k_steps > 1 else (1 if sb else 2)
        c_nb = 1 if sb else 2
        t = x_nb * bm * block_k * csize
        t += o_nb * bm * proj_pad * osize
        t += w1_nb * block_k * proj_pad * csize
        t += c_nb * (proj_pad * proj_pad * csize + 2 * proj_pad * 4)
        t += bm * proj_pad * 4                        # h / layer-2 f32 intermediate
        if k_steps > 1:
            t += bm * proj_pad * 4                    # f32 accumulator scratch
        return t

    if block_m is None:
        if num_tc >= 2 and B > _SUBLANE:
            # v7x: two TensorCores -> at least two M tiles on the "parallel" axis.
            half = pl.cdiv(B, 2)
            block_m = _round_up(half, 256) if B >= 1024 else _round_up(half, _SUBLANE)
        else:
            # Single TensorCore: one big M tile whenever the budget allows.
            block_m = _round_up(B, _SUBLANE)
        while block_m > _SUBLANE and _tile_bytes(block_m) > budget:
            nm = block_m // 2
            if nm >= _LANE:
                nm = (nm // _LANE) * _LANE            # MXU-friendly 128-multiples
            block_m = max(_SUBLANE, _round_up(nm, _SUBLANE))
        # TODO(synk): for proj_pad >= 2048 stream w2 column tiles from HBM
        # (pl.ANY + emit_pipeline in the finalize) instead of shrinking block_m.
    block_m = max(_SUBLANE, _round_up(block_m, _SUBLANE))
    b_pad = _round_up(B, block_m)
    m_steps = b_pad // block_m

    # ---- pad & cast operands only when actually required ----
    def _prep(a, shape, dtype):
        if a.shape == tuple(shape):
            return a if a.dtype == dtype else a.astype(dtype)
        out = jnp.zeros(shape, dtype)
        return out.at[tuple(slice(0, s) for s in a.shape)].set(a.astype(dtype))

    x_p = _prep(x, (b_pad, k_pad), compute_dtype)
    w1_p = _prep(w1, (k_pad, proj_pad), compute_dtype)
    w2_p = _prep(w2, (proj_pad, proj_pad), compute_dtype)
    b1_p = _prep(b1.reshape(1, -1), (1, proj_pad), jnp.float32)
    b2_p = _prep(b2.reshape(1, -1), (1, proj_pad), jnp.float32)

    def _spec(shape, index_map, nbuf):
        if sb and nbuf == 1:
            return pl.BlockSpec(shape, index_map, pipeline_mode=pl.Buffered(1))
        return pl.BlockSpec(shape, index_map)

    cost = pl.CostEstimate(
        flops=2 * B * (input_dim * proj_dim + proj_dim * proj_dim),
        transcendentals=0,
        bytes_accessed=int(B * input_dim * csize
                           + input_dim * proj_dim * csize
                           + proj_dim * proj_dim * csize
                           + 2 * proj_dim * 4
                           + B * proj_dim * osize),
    )

    if k_steps == 1:
        grid = (m_steps,)
        x_nbuf = 1 if m_steps == 1 else 2
        in_specs = [
            _spec((block_m, k_pad), lambda i: (i, 0), x_nbuf),       # x tile
            _spec((k_pad, proj_pad), lambda i: (0, 0), 1),           # w1 (const)
            _spec((1, proj_pad), lambda i: (0, 0), 1),               # b1 (const)
            _spec((proj_pad, proj_pad), lambda i: (0, 0), 1),        # w2 (const)
            _spec((1, proj_pad), lambda i: (0, 0), 1),               # b2 (const)
        ]
        out_spec = _spec((block_m, proj_pad), lambda i: (i, 0), x_nbuf)
        scratch = []
        kernel = _kernel_fused
        dims = ("parallel",)
    else:
        grid = (m_steps, k_steps)
        in_specs = [
            pl.BlockSpec((block_m, block_k), lambda i, k: (i, k)),   # x tile
            pl.BlockSpec((block_k, proj_pad), lambda i, k: (k, 0)),  # w1 K tile
            _spec((1, proj_pad), lambda i, k: (0, 0), 1),            # b1 (const)
            _spec((proj_pad, proj_pad), lambda i, k: (0, 0), 1),     # w2 (const)
            _spec((1, proj_pad), lambda i, k: (0, 0), 1),            # b2 (const)
        ]
        out_spec = _spec((block_m, proj_pad), lambda i, k: (i, 0),
                         1 if m_steps == 1 else 2)
        scratch = [pltpu.VMEM((block_m, proj_pad), jnp.float32)]
        kernel = _kernel_ksplit
        dims = ("parallel", "arbitrary")

    out_p = pl.pallas_call(
        kernel,
        out_shape=jax.ShapeDtypeStruct((b_pad, proj_pad), out_dtype),
        grid_spec=pltpu.PrefetchScalarGridSpec(
            num_scalar_prefetch=0,
            grid=grid,
            in_specs=in_specs,
            out_specs=out_spec,
            scratch_shapes=scratch,
        ),
        compiler_params=pltpu.CompilerParams(
            dimension_semantics=dims,
            vmem_limit_bytes=vmem_limit,
        ),
        cost_estimate=cost,
    )(x_p, w1_p, b1_p, w2_p, b2_p)

    if b_pad == B and proj_pad == proj_dim:
        return out_p
    return out_p[:B, :proj_dim]


def projection_head(x, w1, b1, w2, b2, **kwargs):
    """x: (B, input_dim); w1: (input_dim, proj); b1: (proj,) or (1, proj);
    w2: (proj, proj); b2 like b1 -> (B, proj).  Equivalent to
    layer2(relu(layer1(x))) with torch weights stored transposed."""
    if _HAS_BUFFERED:
        try:
            return _projection_head_impl(x, w1, b1, w2, b2,
                                         single_buffer=True, **kwargs)
        except _FALLBACK_ERRORS:
            pass   # older Pallas without pipeline_mode=pl.Buffered support
    return _projection_head_impl(x, w1, b1, w2, b2,
                                 single_buffer=False, **kwargs)


def projection_head_ref(x, w1, b1, w2, b2):
    h = jnp.maximum(x @ w1 + b1.reshape(1, -1), 0.0)
    return h @ w2 + b2.reshape(1, -1)


def init_params(key, input_dim, projection_dim, dtype=jnp.float32):
    """Deterministic init mimicking nn.Linear's uniform(-1/sqrt(fan_in), ...)."""
    k1, k2, k3, k4 = jax.random.split(key, 4)
    lim1 = 1.0 / (input_dim ** 0.5)
    lim2 = 1.0 / (projection_dim ** 0.5)
    w1 = jax.random.uniform(k1, (input_dim, projection_dim), dtype, -lim1, lim1)
    b1 = jax.random.uniform(k2, (projection_dim,), dtype, -lim1, lim1)
    w2 = jax.random.uniform(k3, (projection_dim, projection_dim), dtype, -lim2, lim2)
    b2 = jax.random.uniform(k4, (projection_dim,), dtype, -lim2, lim2)
    return w1, b1, w2, b2


if __name__ == "__main__":
    batch = 8
    input_dim = 32
    projection_dim = 16
    # NOTE: at this toy size the kernel is dominated by per-call overhead; the
    # generation-aware tiling above is what matters at realistic sizes.

    key = jax.random.PRNGKey(0)
    kx, kp = jax.random.split(key)
    x = jax.random.normal(kx, (batch, input_dim), jnp.float32)
    w1, b1, w2, b2 = init_params(kp, input_dim, projection_dim)

    out = projection_head(x, w1, b1, w2, b2)
    out = jax.block_until_ready(out)
    assert out.shape == (batch, projection_dim)

    # Reference using the same bf16-matmul / f32-accumulate numerics as the kernel.
    bf = jnp.bfloat16
    h_ref = jnp.maximum(
        jnp.dot(x.astype(bf), w1.astype(bf), preferred_element_type=jnp.float32)
        + b1.reshape(1, -1), 0.0)
    ref_bf16 = (jnp.dot(h_ref.astype(bf), w2.astype(bf),
                        preferred_element_type=jnp.float32) + b2.reshape(1, -1))
    assert jnp.allclose(out, ref_bf16, atol=2e-3, rtol=2e-3), float(
        jnp.max(jnp.abs(out - ref_bf16)))

    # Full-f32 reference (loose tolerance: the kernel's matmuls are bf16 on the MXU).
    ref_f32 = projection_head_ref(x, w1, b1, w2, b2)
    assert jnp.allclose(out, ref_f32, atol=3e-2, rtol=3e-2)

    print("KERNEL_OK")
</pallas_src>

<mosaic_0001>
module attributes {stable_mosaic.version = 11 : i64} {
  func.func @_kernel_fused(%arg0: i32, %arg1: memref<8x32xbf16, #tpu.memory_space<vmem>>, %arg2: memref<32x128xbf16, #tpu.memory_space<vmem>>, %arg3: memref<1x128xf32, #tpu.memory_space<vmem>>, %arg4: memref<128x128xbf16, #tpu.memory_space<vmem>>, %arg5: memref<1x128xf32, #tpu.memory_space<vmem>>, %arg6: memref<8x128xf32, #tpu.memory_space<vmem>>) attributes {dimension_semantics = [#tpu.dimension_semantics<parallel>], iteration_bounds = array<i64: 1>, scalar_prefetch = 0 : i64, scratch_operands = 0 : i64, tpu.core_type = #tpu.core_type<tc>, window_params = [{pipeline_mode = #tpu.pipeline_mode<synchronous>, transform_indices = @transform_0, window_bounds = array<i64: 8, 32>}, {pipeline_mode = #tpu.pipeline_mode<synchronous>, transform_indices = @transform_1, window_bounds = array<i64: 32, 128>}, {pipeline_mode = #tpu.pipeline_mode<synchronous>, transform_indices = @transform_2, window_bounds = array<i64: 1, 128>}, {pipeline_mode = #tpu.pipeline_mode<synchronous>, transform_indices = @transform_3, window_bounds = array<i64: 128, 128>}, {pipeline_mode = #tpu.pipeline_mode<synchronous>, transform_indices = @transform_4, window_bounds = array<i64: 1, 128>}, {pipeline_mode = #tpu.pipeline_mode<synchronous>, transform_indices = @transform_5, window_bounds = array<i64: 8, 128>}]} {
    %c0 = arith.constant 0 : index
    %c0_0 = arith.constant 0 : index
    %0 = vector.load %arg1[%c0, %c0_0] : memref<8x32xbf16, #tpu.memory_space<vmem>>, vector<8x32xbf16>
    %c0_1 = arith.constant 0 : index
    %c0_2 = arith.constant 0 : index
    %1 = vector.load %arg2[%c0_1, %c0_2] : memref<32x128xbf16, #tpu.memory_space<vmem>>, vector<32x128xbf16>
    %cst = arith.constant dense<0.000000e+00> : vector<8x128xf32>
    %2 = tpu.matmul %0, %1, %cst {dimension_numbers = #tpu.dot_dimension_numbers<[1], [0], [0], [1], [0, 0, 1, 1], [], []>} : vector<8x32xbf16>, vector<32x128xbf16>, vector<8x128xf32> -> vector<8x128xf32>
    %c0_3 = arith.constant 0 : index
    %c0_4 = arith.constant 0 : index
    %3 = vector.load %arg3[%c0_3, %c0_4] : memref<1x128xf32, #tpu.memory_space<vmem>>, vector<1x128xf32>
    %4 = vector.broadcast %3 : vector<1x128xf32> to vector<8x128xf32>
    %5 = arith.addf %2, %4 : vector<8x128xf32>
    %cst_5 = arith.constant 0.000000e+00 : f32
    %6 = vector.broadcast %cst_5 : f32 to vector<8x128xf32>
    %7 = arith.maximumf %5, %6 : vector<8x128xf32>
    %8 = arith.truncf %7 : vector<8x128xf32> to vector<8x128xbf16>
    %c0_6 = arith.constant 0 : index
    %c0_7 = arith.constant 0 : index
    %9 = vector.load %arg4[%c0_6, %c0_7] : memref<128x128xbf16, #tpu.memory_space<vmem>>, vector<128x128xbf16>
    %cst_8 = arith.constant dense<0.000000e+00> : vector<8x128xf32>
    %10 = tpu.matmul %8, %9, %cst_8 {dimension_numbers = #tpu.dot_dimension_numbers<[1], [0], [0], [1], [0, 0, 1, 1], [], []>} : vector<8x128xbf16>, vector<128x128xbf16>, vector<8x128xf32> -> vector<8x128xf32>
    %c0_9 = arith.constant 0 : index
    %c0_10 = arith.constant 0 : index
    %11 = vector.load %arg5[%c0_9, %c0_10] : memref<1x128xf32, #tpu.memory_space<vmem>>, vector<1x128xf32>
    %12 = vector.broadcast %11 : vector<1x128xf32> to vector<8x128xf32>
    %13 = arith.addf %10, %12 : vector<8x128xf32>
    %c0_11 = arith.constant 0 : index
    %c0_12 = arith.constant 0 : index
    %14 = vector.load %arg6[%c0_11, %c0_12] : memref<8x128xf32, #tpu.memory_space<vmem>>, vector<8x128xf32>
    tpu.vector_store %arg6[%c0_11, %c0_12], %13 {strides = array<i32>} : memref<8x128xf32, #tpu.memory_space<vmem>>, vector<8x128xf32>,
    return
  }
  func.func @transform_0(%arg0: i32) -> (i32, i32) {
    %c0_i32 = arith.constant 0 : i32
    %c0_i32_0 = arith.constant 0 : i32
    return %arg0, %c0_i32 : i32, i32
  }
  func.func @transform_1(%arg0: i32) -> (i32, i32) {
    %c0_i32 = arith.constant 0 : i32
    %c0_i32_0 = arith.constant 0 : i32
    %c0_i32_1 = arith.constant 0 : i32
    return %c0_i32, %c0_i32_0 : i32, i32
  }
  func.func @transform_2(%arg0: i32) -> (i32, i32) {
    %c0_i32 = arith.constant 0 : i32
    %c0_i32_0 = arith.constant 0 : i32
    %c0_i32_1 = arith.constant 0 : i32
    return %c0_i32, %c0_i32_0 : i32, i32
  }
  func.func @transform_3(%arg0: i32) -> (i32, i32) {
    %c0_i32 = arith.constant 0 : i32
    %c0_i32_0 = arith.constant 0 : i32
    %c0_i32_1 = arith.constant 0 : i32
    return %c0_i32, %c0_i32_0 : i32, i32
  }
  func.func @transform_4(%arg0: i32) -> (i32, i32) {
    %c0_i32 = arith.constant 0 : i32
    %c0_i32_0 = arith.constant 0 : i32
    %c0_i32_1 = arith.constant 0 : i32
    return %c0_i32, %c0_i32_0 : i32, i32
  }
  func.func @transform_5(%arg0: i32) -> (i32, i32) {
    %c0_i32 = arith.constant 0 : i32
    %c0_i32_0 = arith.constant 0 : i32
    return %arg0, %c0_i32 : i32, i32
  }
}

</mosaic_0001>

<bundles_post_ra>
// kernel: _projection_head_impl.1
= control target key start
LH: loop header
LB: loop body
LE: loop exit
PB: predicated region body
PF: predicated region fallthrough
CT: control target
= control target key end

     0   :  { %s313_s0 = inlined_call_operand.vmem [shape: bf16[8,32], index: 0, kind: input, shape index: {}]   ;;  %s314_s1 = inlined_call_operand.vmem [shape: bf16[32,128], index: 1, kind: input, shape index: {}]   ;;  %s315_s2 = inlined_call_operand.vmem [shape: f32[1,128], index: 2, kind: input, shape index: {}]   ;;  %s316_s3 = inlined_call_operand.vmem [shape: bf16[128,128], index: 3, kind: input, shape index: {}]   ;;  %s317_s4 = inlined_call_operand.vmem [shape: f32[1,128], index: 4, kind: input, shape index: {}]   ;;  %s318_s5 = inlined_call_operand.hbm [shape: f32[8,128], index: 5, kind: output, shape index: {}]  }
   0x1   :  { %v202_v0 = vld [vmem:[%s314_s1 + $0x8] sm:$0xff]  ;;  %v210_v1 = vld [vmem:[%s316_s3 + $0x38] sm:$0xff]  ;;  %v201_v2 = vld [vmem:[%s314_s1] sm:$0xff] }
   0x2   :  { %53 = vmatpush.bf16.msra.mxu0 %v202_v0  ;;  %130 = vmatpush.bf16.msra.mxu1 %v210_v1  ;;  %v209_v3 = vld [vmem:[%s316_s3 + $0x30] sm:$0xff] }
   0x3   :  { %10 = vsyncpa [#allocation3], 0  ;;  %v22_v4 = vld [vmem:[%s313_s0] sm:$0xf]  ;;  %vm43_vm0 = vcmask 261120   ;;  %v208_v5 = vld [vmem:[%s316_s3 + $0x28] sm:$0xff] }
   0x4   :  { %v207_v6 = vld [vmem:[%s316_s3 + $0x20] sm:$0xff]  ;;  %v206_v7 = vld [vmem:[%s316_s3 + $0x18] sm:$0xff]  ;;  %v205_v8 = vld [vmem:[%s316_s3 + $0x10] sm:$0xff]  ;;  %s240_s17 = smov [#allocation2]  }
   0x5   :  { %v204_v9 = vld [vmem:[%s316_s3 + $0x8] sm:$0xff]  ;;  %v203_v10 = vld [vmem:[%s316_s3] sm:$0xff]  ;;  %s149_s18 = sshll.u32 %s240_s17, 4  ;;  %s151_s3 = sshll.u32 %s318_s5, 4  ;;  %s150_s18 = int_to_ptr.vmem [resolvable:$true] %s149_s18  ;;  %s152_s3 = int_to_ptr.hbm [resolvable:$true] %s151_s3 }
   0x6   :  { %54 = vmatpush.bf16.msra.mxu0 %v201_v2  ;;  %131 = vmatpush.bf16.msra.mxu1 %v209_v3  ;;  %v212_v11 = vld [vmem:[%s315_s2] ss:$0 sm:$0xff] }
   0x7   :  { %v213_v17 = vld [vmem:[%s317_s4] ss:$0 sm:$0xff] }
   0x9   :  { %168 = vmatmul.msk.bf16.vlgmr.msra.gmra.mxu0 %vm43_vm0, %v22_v4 }
   0xa   :  { %132 = vmatpush.bf16.msra.mxu1 %v208_v5 }
   0xe   :  { %133 = vmatpush.bf16.msra.mxu1 %v207_v6 }
  0x12   :  { %134 = vmatpush.bf16.msra.mxu1 %v206_v7 }
  0x16   :  { %135 = vmatpush.bf16.msra.mxu1 %v205_v8 }
  0x1a   :  { %136 = vmatpush.bf16.msra.mxu1 %v204_v9 }
  0x1e   :  { %137 = vmatpush.bf16.msra.mxu1 %v203_v10 }
  0x86   :  { %v56_v12 = vpop.f32.mrf.mxu0 }
  0x87   :  { %v57_v13 = vadd.f32 %v212_v11, %v56_v12 }
  0x89   :  { %v60_v14 = vmax.f32 %v57_v13, 0.0 }
  0x8b   :  { %v61_v15 = vpack.c.bf16 %v60_v14, %v60_v14 }
  0x8d   :  { %138 = vmatmul.bf16.vlgmr.msra.gmra.mxu1 %v61_v15 }
  0x8e   :  { %v58_v16 = vpop.f32.mrf.mxu0 }
 0x10a   :  { %v139_v18 = vpop.f32.mrf.mxu1 }
 0x10b   :  { %v140_v19 = vadd.f32 %v213_v17, %v139_v18 }
 0x10d   :  { %143 = vst [vmem:[#allocation2] sm:$0xff] %v140_v19 }
 0x10e   :  { %154 = dma.vmem_to_hbm [thread:$0]  %s150_s18, 128, %s152_s3, [#allocation3]  }
 0x112   :  { %v141_v20 = vpop.f32.mrf.mxu1 }
 0x113   :  { %238 = dma.done.wait [#allocation3], 128  }
 0x114   :  { %239 = vsyncadd [#allocation3], 4294967168 }
 0x115   :  { %159 = vsyncpa [#allocation3], 1 }

</bundles_post_ra>
